<compile_context>
chip_gen: v7x
topology: tpu7x:2x2x1
jax: 0.10.0
libtpu: 0.0.40
codegen_flags: <defaults>
</compile_context>

<pallas_src>
import functools
from typing import NamedTuple, Optional

import jax
import jax.numpy as jnp
from jax.experimental import pallas as pl
from jax.experimental.pallas import tpu as pltpu


def _round_up(x, m):
    return (x + m - 1) // m * m


def _physical_vmem_bytes():
    try:
        return int(pltpu.get_tpu_info().vmem_capacity_bytes)
    except Exception:
        return 64 * 1024 * 1024  # conservative: v7x per-TensorCore VMEM


_PHYS_VMEM = _physical_vmem_bytes()


# ----------------------------------------------------------------------------
# One-time weight prepack (load time, NOT per forward call).
# ----------------------------------------------------------------------------
class PackedW8A16(NamedTuple):
    wt: jax.Array          # [k_pad, n_pad] int8: transposed + padded weight
    scale_bias: jax.Array  # [2, n_pad] f32: row 0 = scale, row 1 = bias
    out_features: int
    in_features: int
    tn: int                # N tile baked into the padding
    tk: int                # K tile baked into the padding


def prepack_w8a16(int8_weight, scale, bias=None, *, tn=1024, tk=1024):
    """Relayout int8 weight [N, K] -> padded [K_pad, N_pad] once, fuse scale/bias."""
    N, K = int8_weight.shape
    tn_ = min(tn, _round_up(N, 128))
    tk_ = min(tk, _round_up(K, 128))
    n_pad = _round_up(N, tn_)
    # Expose >= 2 blocks along the parallel N axis when possible (v7x: 2 TCs).
    while n_pad // tn_ < 2 and tn_ % 256 == 0:
        tn_ //= 2
        n_pad = _round_up(N, tn_)
    k_pad = _round_up(K, tk_)

    wt = jnp.asarray(int8_weight, dtype=jnp.int8).T  # [K, N] (contraction leading)
    if (k_pad, n_pad) != (K, N):
        wt = jnp.pad(wt, ((0, k_pad - K), (0, n_pad - N)))

    scale_row = jnp.asarray(scale, jnp.float32).reshape(N)
    if bias is None:
        bias_row = jnp.zeros((N,), jnp.float32)
    else:
        bias_row = jnp.asarray(bias, jnp.float32).reshape(N)
    sb = jnp.stack([scale_row, bias_row], axis=0)  # [2, N]
    if n_pad != N:
        sb = jnp.pad(sb, ((0, 0), (0, n_pad - N)))

    return PackedW8A16(jax.block_until_ready(wt), jax.block_until_ready(sb),
                       N, K, tn_, tk_)


# ----------------------------------------------------------------------------
# Kernels.
# ----------------------------------------------------------------------------
def _make_kernel(compute_dtype, n_k_steps, use_acc_scratch):
    """Kernel factory specialized on compute dtype / K steps / scratch usage."""

    def _operands(x_ref, wt_ref):
        x = x_ref[...].astype(compute_dtype)          # activations
        w = wt_ref[...].astype(compute_dtype)         # int8 dequant (exact)
        return x, w

    if n_k_steps == 1:
        # Fast path: no accumulator machinery at all.
        def kernel(x_ref, wt_ref, sb_ref, o_ref):
            x, w = _operands(x_ref, wt_ref)
            acc = jnp.dot(x, w, preferred_element_type=jnp.float32)
            out = acc * sb_ref[0:1, :] + sb_ref[1:2, :]
            o_ref[...] = out.astype(o_ref.dtype)
        return kernel

    if use_acc_scratch:
        # Non-f32 output: accumulate in a dedicated f32 VMEM scratch.
        def kernel(x_ref, wt_ref, sb_ref, o_ref, acc_ref):
            k = pl.program_id(2)

            @pl.when(k == 0)
            def _():
                acc_ref[...] = jnp.zeros_like(acc_ref)

            x, w = _operands(x_ref, wt_ref)
            acc_ref[...] += jnp.dot(x, w, preferred_element_type=jnp.float32)

            @pl.when(k == n_k_steps - 1)
            def _():
                out = acc_ref[...] * sb_ref[0:1, :] + sb_ref[1:2, :]
                o_ref[...] = out.astype(o_ref.dtype)
        return kernel

    # f32 output: accumulate directly into the (K-resident) output tile.
    def kernel(x_ref, wt_ref, sb_ref, o_ref):
        k = pl.program_id(2)

        @pl.when(k == 0)
        def _():
            o_ref[...] = jnp.zeros_like(o_ref)

        x, w = _operands(x_ref, wt_ref)
        o_ref[...] += jnp.dot(x, w, preferred_element_type=jnp.float32)

        @pl.when(k == n_k_steps - 1)
        def _():
            o_ref[...] = o_ref[...] * sb_ref[0:1, :] + sb_ref[1:2, :]
    return kernel


def _weight_spec(tk, tn, deep_buffer):
    """Weight BlockSpec; 3-deep buffering in the weight-bandwidth-bound regime."""
    w_map = lambda i, j, kk: (kk, j)
    if deep_buffer:
        try:
            return pl.BlockSpec((tk, tn), w_map, pipeline_mode=pl.Buffered(3)), 3
        except (TypeError, AttributeError):
            pass
    return pl.BlockSpec((tk, tn), w_map), 2


def _vmem_limit_bytes(tm, tn, tk, x_itemsize, out_itemsize, w_buffers, use_acc):
    footprint = (
        2 * tm * tk * x_itemsize          # activation double buffer
        + w_buffers * tk * tn             # int8 weight buffers
        + 2 * 2 * tn * 4                  # fused scale/bias double buffer
        + 2 * tm * tn * out_itemsize      # output double buffer
        + (tm * tn * 4 if use_acc else 0)  # f32 accumulator scratch
    )
    limit = 2 * footprint + (16 << 20)             # headroom for Mosaic scratch
    cap = max(_PHYS_VMEM - (8 << 20), 32 << 20)    # never request all of VMEM
    return int(min(max(limit, 32 << 20), cap))


# ----------------------------------------------------------------------------
# Forward.
# ----------------------------------------------------------------------------
@functools.partial(
    jax.jit,
    static_argnames=("out_features", "in_features", "tn", "tk", "tm", "out_dtype"))
def _w8a16_linear_impl(x, wt, scale_bias, *, out_features, in_features,
                       tn, tk, tm, out_dtype):
    orig_shape = x.shape
    K = orig_shape[-1]
    x2d = x.reshape((-1, K))
    M = x2d.shape[0]
    k_pad, n_pad = wt.shape

    # bf16 activations stay bf16 (int8 weights are exact in bf16); anything
    # else runs the MXU in f32 (PyTorch casts the weight to the input dtype).
    if x.dtype == jnp.bfloat16:
        compute_dtype = jnp.bfloat16
        m_align = 16  # native (16, 128) bf16 tile
    else:
        compute_dtype = jnp.float32
        m_align = 8

    tm_ = _round_up(min(tm, _round_up(M, m_align)), m_align)
    m_pad = _round_up(M, tm_)
    if (m_pad, k_pad) != (M, K):
        x2d = jnp.pad(x2d, ((0, m_pad - M), (0, k_pad - K)))

    grid = (m_pad // tm_, n_pad // tn, k_pad // tk)
    m_blocks, n_blocks, n_k_steps = grid

    # Decode (single M block) is purely weight-HBM-bound -> 3-deep weight stream.
    w_spec, w_buffers = _weight_spec(
        tk, tn, deep_buffer=(m_blocks == 1 and n_k_steps >= 3))

    use_acc_scratch = (n_k_steps > 1) and (out_dtype != jnp.float32)
    kernel = _make_kernel(compute_dtype, n_k_steps, use_acc_scratch)
    scratch_shapes = ((pltpu.VMEM((tm_, tn), jnp.float32),)
                      if use_acc_scratch else ())

    x_itemsize = jnp.dtype(x2d.dtype).itemsize
    out_itemsize = jnp.dtype(out_dtype).itemsize
    flops = 2 * m_pad * n_pad * k_pad
    bytes_accessed = (
        m_pad * k_pad * x_itemsize * n_blocks   # activations re-streamed per N block
        + k_pad * n_pad * m_blocks              # int8 weight re-streamed per M block
        + m_pad * n_pad * out_itemsize          # output writeback
        + 2 * n_pad * 4 * m_blocks              # fused scale/bias
    )

    out2d = pl.pallas_call(
        kernel,
        out_shape=jax.ShapeDtypeStruct((m_pad, n_pad), out_dtype),
        grid_spec=pltpu.PrefetchScalarGridSpec(
            num_scalar_prefetch=0,
            grid=grid,
            in_specs=[
                pl.BlockSpec((tm_, tk), lambda i, j, kk: (i, kk)),   # activations
                w_spec,                                              # int8 [K, N]
                pl.BlockSpec((2, tn), lambda i, j, kk: (0, j)),      # scale+bias
            ],
            out_specs=pl.BlockSpec((tm_, tn), lambda i, j, kk: (i, j)),
            scratch_shapes=scratch_shapes,
        ),
        compiler_params=pltpu.CompilerParams(
            dimension_semantics=("parallel", "parallel", "arbitrary"),
            vmem_limit_bytes=_vmem_limit_bytes(
                tm_, tn, tk, x_itemsize, out_itemsize, w_buffers, use_acc_scratch),
        ),
        cost_estimate=pl.CostEstimate(
            flops=flops, transcendentals=0, bytes_accessed=bytes_accessed),
    )(x2d, wt, scale_bias)

    out2d = out2d[:M, :out_features]
    return out2d.reshape(orig_shape[:-1] + (out_features,))


def w8a16_linear(x, packed: PackedW8A16, *, tm: int = 512,
                 out_dtype: Optional[object] = None):
    """Pallas-backed w8_16_forward(int8_weight, x, scale, bias) on a prepacked weight."""
    if x.shape[-1] != packed.in_features:
        raise ValueError(f"last dim {x.shape[-1]} != in_features {packed.in_features}")
    if out_dtype is None:
        # PyTorch promotion: (x @ w.to(x.dtype).T) * f32 scale -> f32.
        out_dtype = jnp.result_type(x.dtype, jnp.float32)
    return _w8a16_linear_impl(
        x, packed.wt, packed.scale_bias,
        out_features=packed.out_features, in_features=packed.in_features,
        tn=packed.tn, tk=packed.tk, tm=tm, out_dtype=jnp.dtype(out_dtype))


def w8a16_linear_from_raw(x, int8_weight, scale, bias=None, **kwargs):
    """Convenience wrapper (prepacks per call; prefer prepack_w8a16 + w8a16_linear)."""
    return w8a16_linear(x, prepack_w8a16(int8_weight, scale, bias), **kwargs)


# ----------------------------------------------------------------------------
# Reference + demo.
# ----------------------------------------------------------------------------
def w8_16_forward_ref(int8_weight, x, scale, bias=None):
    w = int8_weight.astype(jnp.float32)
    out = jnp.einsum("...k,nk->...n", x.astype(jnp.float32), w)
    out = out * scale.astype(jnp.float32)
    if bias is not None:
        out = out + bias.astype(jnp.float32)
    return out


if __name__ == "__main__":
    key = jax.random.PRNGKey(0)
    k_w, k_s, k_b, k_x = jax.random.split(key, 4)

    batch, seq, in_features, out_features = 2, 8, 384, 256

    # Parameters matching W8A16LinearLayer.__init__.
    int8_weight = jax.random.randint(
        k_w, (out_features, in_features), -128, 127, dtype=jnp.int32
    ).astype(jnp.int8)
    scale = jax.random.normal(k_s, (out_features,), dtype=jnp.float32)
    bias_zero = jnp.zeros((1, out_features), dtype=jnp.float32)   # module default
    bias_rand = jax.random.normal(k_b, (1, out_features), dtype=jnp.float32)

    x_bf16 = jax.random.normal(k_x, (batch, seq, in_features), dtype=jnp.bfloat16)
    x_f32 = x_bf16.astype(jnp.float32)

    def check(out, ref, tol=2e-2):
        out = jax.block_until_ready(out)
        assert out.shape == ref.shape, (out.shape, ref.shape)
        err = float(jnp.max(jnp.abs(out.astype(jnp.float32) - ref)))
        denom = float(jnp.max(jnp.abs(ref))) + 1e-6
        assert err / denom < tol, (err, denom)

    # 1) Default (prefill-style) prepack: K fits one tile -> direct fast path;
    #    bf16 activations, module-default zero bias, f32 output.
    packed_big = prepack_w8a16(int8_weight, scale, bias_zero)
    out1 = w8a16_linear(x_bf16, packed_big)
    ref1 = w8_16_forward_ref(int8_weight, x_bf16, scale, bias_zero)
    assert out1.dtype == jnp.float32
    check(out1, ref1)

    # 2) Small tiles -> K-reduction accumulate-into-output path + Buffered(3)
    #    decode weight stream; nonzero bias.
    packed_small = prepack_w8a16(int8_weight, scale, bias_rand, tn=128, tk=128)
    out2 = w8a16_linear(x_bf16, packed_small)
    ref2 = w8_16_forward_ref(int8_weight, x_bf16, scale, bias_rand)
    check(out2, ref2)

    # 3) f32 activations (f32 MXU path, no silent bf16 downcast).
    out3 = w8a16_linear(x_f32, packed_big)
    ref3 = w8_16_forward_ref(int8_weight, x_f32, scale, bias_zero)
    check(out3, ref3)

    # 4) bf16 out_dtype override with a K reduction -> f32 acc-scratch path.
    out4 = w8a16_linear(x_bf16, packed_small, out_dtype=jnp.bfloat16)
    assert out4.dtype == jnp.bfloat16
    check(out4, ref2)

    print("KERNEL_OK")
</pallas_src>

<mosaic_0001>
module attributes {stable_mosaic.version = 11 : i64} {
  func.func @kernel(%arg0: i32, %arg1: i32, %arg2: i32, %arg3: memref<16x384xbf16, #tpu.memory_space<vmem>>, %arg4: memref<384x128xi8, #tpu.memory_space<vmem>>, %arg5: memref<2x128xf32, #tpu.memory_space<vmem>>, %arg6: memref<16x128xf32, #tpu.memory_space<vmem>>) attributes {dimension_semantics = [#tpu.dimension_semantics<parallel>, #tpu.dimension_semantics<parallel>, #tpu.dimension_semantics<arbitrary>], iteration_bounds = array<i64: 1, 2, 1>, scalar_prefetch = 0 : i64, scratch_operands = 0 : i64, tpu.core_type = #tpu.core_type<tc>, window_params = [{transform_indices = @transform_0, window_bounds = array<i64: 16, 384>}, {transform_indices = @transform_1, window_bounds = array<i64: 384, 128>}, {transform_indices = @transform_2, window_bounds = array<i64: 2, 128>}, {transform_indices = @transform_3, window_bounds = array<i64: 16, 128>}]} {
    %c0 = arith.constant 0 : index
    %c0_0 = arith.constant 0 : index
    %0 = vector.load %arg3[%c0, %c0_0] : memref<16x384xbf16, #tpu.memory_space<vmem>>, vector<16x384xbf16>
    %c0_1 = arith.constant 0 : index
    %c0_2 = arith.constant 0 : index
    %1 = vector.load %arg4[%c0_1, %c0_2] : memref<384x128xi8, #tpu.memory_space<vmem>>, vector<384x128xi8>
    %2 = arith.sitofp %1 : vector<384x128xi8> to vector<384x128xbf16>
    %cst = arith.constant dense<0.000000e+00> : vector<16x128xf32>
    %3 = tpu.matmul %0, %2, %cst {dimension_numbers = #tpu.dot_dimension_numbers<[1], [0], [0], [1], [0, 0, 1, 1], [], []>} : vector<16x384xbf16>, vector<384x128xbf16>, vector<16x128xf32> -> vector<16x128xf32>
    %c0_3 = arith.constant 0 : index
    %c0_4 = arith.constant 0 : index
    %4 = vector.load %arg5[%c0_3, %c0_4] : memref<2x128xf32, #tpu.memory_space<vmem>>, vector<1x128xf32>
    %5 = vector.broadcast %4 : vector<1x128xf32> to vector<16x128xf32>
    %6 = arith.mulf %3, %5 : vector<16x128xf32>
    %c1 = arith.constant 1 : index
    %c0_5 = arith.constant 0 : index
    %7 = vector.load %arg5[%c1, %c0_5] : memref<2x128xf32, #tpu.memory_space<vmem>>, vector<1x128xf32>
    %8 = vector.broadcast %7 : vector<1x128xf32> to vector<16x128xf32>
    %9 = arith.addf %6, %8 : vector<16x128xf32>
    %c0_6 = arith.constant 0 : index
    %c0_7 = arith.constant 0 : index
    %10 = vector.load %arg6[%c0_6, %c0_7] : memref<16x128xf32, #tpu.memory_space<vmem>>, vector<16x128xf32>
    tpu.vector_store %arg6[%c0_6, %c0_7], %9 {strides = array<i32>} : memref<16x128xf32, #tpu.memory_space<vmem>>, vector<16x128xf32>,
    return
  }
  func.func @transform_0(%arg0: i32, %arg1: i32, %arg2: i32) -> (i32, i32) {
    %c0_i32 = arith.constant 0 : i32
    return %arg0, %arg2 : i32, i32
  }
  func.func @transform_1(%arg0: i32, %arg1: i32, %arg2: i32) -> (i32, i32) {
    %c0_i32 = arith.constant 0 : i32
    return %arg2, %arg1 : i32, i32
  }
  func.func @transform_2(%arg0: i32, %arg1: i32, %arg2: i32) -> (i32, i32) {
    %c0_i32 = arith.constant 0 : i32
    %c0_i32_0 = arith.constant 0 : i32
    return %c0_i32, %arg1 : i32, i32
  }
  func.func @transform_3(%arg0: i32, %arg1: i32, %arg2: i32) -> (i32, i32) {
    %c0_i32 = arith.constant 0 : i32
    return %arg0, %arg1 : i32, i32
  }
}

</mosaic_0001>

<bundles_post_ra>
// kernel: _w8a16_linear_impl.1
= control target key start
LH: loop header
LB: loop body
LE: loop exit
PB: predicated region body
PF: predicated region fallthrough
CT: control target
= control target key end

     0   :  { %8 = vsyncpa [#allocation3], 0  ;;  %s1138_s0 = inlined_call_operand.hbm [shape: bf16[16,384], index: 0, kind: input, shape index: {}]   ;;  %s1139_s1 = inlined_call_operand.hbm [shape: s8[384,256], index: 1, kind: input, shape index: {}]   ;;  %s1140_s2 = inlined_call_operand.vmem [shape: f32[2,256], index: 2, kind: input, shape index: {}]   ;;  %s1141_s3 = inlined_call_operand.hbm [shape: f32[16,256], index: 3, kind: output, shape index: {}]  }
   0x1   :  { %9 = vsyncpa [#allocation6], 0 }
   0x2   :  { %11 = vsyncpa [#allocation6 + $0x1], 0 }
   0x3   :  { %12 = vsyncpa [#allocation4], 0 }
   0x4   :  { %14 = vsyncpa [#allocation4 + $0x1], 0  ;;  %s889_s12 = smov 0   ;;  %s891_s13 = smov 0  }
   0x5   :  { %s893_s14 = smov 0   ;;  %s895_s15 = smov 0  }
   0x6   :  { %s897_s16 = smov 0   ;;  %s899_s17 = smov 0  }
   0x7 LB: > { %s551_s18 = sadd.s32 4294967295, %s854_s17   ;;  %s552_s19 = sadd.s32 4294967294, %s854_s17   ;;  %s854_s17 = sphi %s899_s17, %s20_s17   ;;  %s850_s16 = sphi %s897_s16, %s1167_s16   ;;  %s846_s15 = sphi %s895_s15, %s1166_s15   ;;  %s842_s14 = sphi %s893_s14, %s1165_s14   ;;  %s838_s13 = sphi %s891_s13, %s1164_s13   ;;  %s834_s12 = sphi %s889_s12, %s1163_s12  }
   0x8   : > { %p83_p0 = scmp.ne.s32.totalorder %s842_s14, %s838_s13  ;;  %p84_p1 = scmp.eq.s32.totalorder %s854_s17, 0 }
   0x9   : > { %p89_p2 = scmp.ne.s32.totalorder %s838_s13, %s834_s12  ;;  %p926_p3 = scmp.eq.s32.totalorder %s551_s18, 0 }
   0xa   : > { %p930_p4 = por %p84_p1, %p83_p0  ;;  %p141_p5 = scmp.eq.s32.totalorder %s551_s18, 1 }
   0xb   : > { %s1148_s20 = scalar_select %p926_p3, 1, 0 }
   0xc   : > { %p936_p6 = por %p926_p3, %p89_p2  ;;  %p147_p7 = scmp.eq.s32.totalorder %s552_s19, 1 }
   0xd   : > { %p940_p8 = por %p141_p5, %p83_p0  ;;  %p553_p9 = scmp.ge.s32.totalorder %s854_s17, 1 }
   0xe   : > { %s1150_s22 = scalar_select %p936_p6, 1, 0 }
   0xf   : > { %s1151_s23 = scalar_select %p940_p8, 1, 0 }
  0x10   : > { %p945_p10 = por %p147_p7, %p89_p2  ;;  %p154_p11 = scmp.lt.s32.totalorder %s854_s17, 3 }
  0x11   : > { %s856_s26 = smov [#allocation2]   ;;  %p644_p1 = scmp.lt.s32.totalorder %s854_s17, 2 }
  0x12   : > { %s1152_s24 = scalar_select %p945_p10, 1, 0 }
  0x13   : > { %p950_p12 = pnand %p553_p9, %p154_p11  ;;  %s172_s27 = sshll.u32 %s856_s26, 4  ;;  %s954_s27 = int_to_ptr.vmem [resolvable:$true] %s172_s27 }
  0x14   : > { %p968_p2 = pnand %p644_p1, %p930_p4  ;;  %s35_s30 = sadd.s32 1, %s850_s16 }
  0x15   : > { %s1153_s25 = scalar_select %p950_p12, 1, 0 }
  0x16   : > { %p631_p13 = pneg %p950_p12  ;;  %s710_s6 = scalar_lea.hbm %s1138_s0, 384 }
  0x17   : > { %s1155_s29 = scalar_select %p968_p2, 1, 0 }
  0x18   : > { %p962_p5 = pnand %p631_p13, %p926_p3  ;;  %p711_p7 = scmp.ne.s32.totalorder %s1138_s0, %s710_s6 }
  0x19   : > { %p717_p4 = scmp.lt.u32.totalorder %s710_s6, %s1138_s0 }
  0x1a   : > { %p712_p9 = pneg %p962_p5 }
  0x1c   : > { %p713_p11 = pnand %p712_p9, %p711_p7 }
  0x1e   : > { %p714_p13 = pneg %p713_p11 }
  0x20   : > { %p719_p1 = pnand %p717_p4, %p714_p13 }
  0x22   : > { %722 = shalt.err (!%p719_p1)
}
  0x23   : > { %s723_s11 = scalar_lea.vmem %s954_s27, 384  ;;  %p731_p6 = scmp.lt.s32.totalorder %s954_s27, %s954_s27 }
  0x24   : > { %p724_p0 = scmp.ne.s32.totalorder %s954_s27, %s723_s11  ;;  %p732_p3 = scmp.lt.s32.totalorder %s723_s11, %s723_s11 }
  0x26   : > { %p726_p10 = pnand %p724_p0, %p712_p9  ;;  %p733_p12 = por %p732_p3, %p731_p6 }
  0x28   : > { %p727_p8 = pneg %p726_p10 }
  0x2a   : > { %p734_p2 = pnand %p733_p12, %p727_p8 }
  0x2c   : > { %737 = shalt.err (!%p734_p2)
}
  0x2d   : > { %s857_s18 = smov 192   ;;  %s858_s19 = smov 12  }
  0x2e   : > { %634 = dma.hbm_to_vmem [thread:$0]  (!%p962_p5), %s1138_s0, 384, %s954_s27, [#allocation3], %s857_s18, %s857_s18, %s858_s19  }
  0x2f   : > { %p37_p10 = scmp.ge.s32.totalorder %s35_s30, 2  ;;  %s76_s4 = sadd.s32 1, %s842_s14 }
  0x30   : > { %s186_s5 = sand.u32 1, %s842_s14   ;;  %s556_s8 = sshll.u32 %s850_s16, 7 }
  0x31   : > { %s1169_s30 = smov (%p37_p10, %s35_s30), 0  ;;  %s621_s6 = smul.u32 96, %s186_s5 }
  0x32   : > { %s72_s7 = ssub.s32 %s850_s16, %s1169_s30  ;;  %s1004_s28 = scalar_lea.hbm %s1139_s1, %s556_s8 }
  0x33   : > { %p74_p3 = scmp.eq.s32.totalorder %s72_s7, 0  ;;  %s190_s27 = scalar_lea.vmem [#allocation5], %s621_s6 }
  0x34   : > { %s199_s11 = sshll.u32 %s190_s27, 4  ;;  %s1011_s19 = scalar_lea.sflag [#allocation6], %s186_s5  ;;  %s1009_s11 = int_to_ptr.vmem [resolvable:$true] %s199_s11 }
  0x35   : > { %s1007_s18 = scalar_select %p74_p3, %s842_s14, %s76_s4  }
  0x36   : > { %s738_s21 = scalar_lea.hbm %s1004_s28, 1536  ;;  %p1156_p8 = scmp.ne.s32.totalorder %s1155_s29, 0 }
  0x37   : > { %p739_p6 = scmp.ne.s32.totalorder %s1004_s28, %s738_s21  ;;  %s743_s8 = scalar_lea.hbm %s1139_s1, 3072 }
  0x38   : > { %p740_p12 = pneg %p1156_p8  ;;  %p744_p2 = scmp.lt.u32.totalorder %s1004_s28, %s1139_s1 }
  0x39   : > { %p745_p7 = scmp.lt.u32.totalorder %s743_s8, %s738_s21  ;;  %p747_p11 = scmp.lt.u32.totalorder %s738_s21, %s1004_s28 }
  0x3a   : > { %p741_p0 = pnand %p740_p12, %p739_p6 }
  0x3b   : > { %p746_p9 = por %p745_p7, %p744_p2 }
  0x3c   : > { %p742_p5 = pneg %p741_p0 }
  0x3d   : > { %p748_p13 = por %p747_p11, %p746_p9 }
  0x3f   : > { %p749_p4 = pnand %p748_p13, %p742_p5 }
  0x41   : > { %752 = shalt.err (!%p749_p4)
}
  0x42   : > { %s753_s4 = scalar_lea.vmem %s1009_s11, 1536  ;;  %s859_s5 = smov [#allocation5]  }
  0x43   : > { %p754_p1 = scmp.ne.s32.totalorder %s1009_s11, %s753_s4  ;;  %s758_s10 = sshll.u32 %s859_s5, 4  ;;  %s759_s10 = int_to_ptr.vmem [resolvable:$false] %s758_s10 }
  0x44   : > { %s760_s27 = scalar_lea.vmem %s759_s10, 3072  ;;  %p761_p6 = scmp.lt.s32.totalorder %s1009_s11, %s759_s10 }
  0x45   : > { %p756_p10 = pnand %p754_p1, %p740_p12  ;;  %p762_p0 = scmp.lt.s32.totalorder %s760_s27, %s753_s4 }
  0x47   : > { %p757_p3 = pneg %p756_p10  ;;  %p763_p2 = por %p762_p0, %p761_p6 }
  0x49   : > { %p764_p7 = pnand %p763_p2, %p757_p3 }
  0x4b   : > { %767 = shalt.err (!%p764_p7)
}
  0x4c   : > { %s860_s21 = smov 256   ;;  %s861_s26 = smov 128  }
  0x4d   : > { %s862_s7 = smov 8   ;;  %p1157_p12 = scmp.ne.s32.totalorder %s1153_s25, 0 }
  0x4e   : > { %638 = dma.hbm_to_vmem [thread:$0]  (!%p1156_p8), %s1004_s28, 1536, %s1009_s11, %s1011_s19, %s860_s21, %s861_s26, %s862_s7  }
  0x4f   : > { %218 = sbr.rel (%p1157_p12) target bundleno = 366 (0x16e), region = 32  ;;  %p1158_p5 = scmp.ne.s32.totalorder (!%p1157_p12), %s1148_s20, 0 }
  0x56   : > { %821 = dma.done.wait (%p1158_p5), [#allocation3], 384  }
  0x57   : > { %823 = vsyncadd (%p1158_p5), [#allocation3], 4294966912  ;;  %s1046_s8 = sand.u32 1, %s838_s13   ;;  %p1159_p8 = scmp.ne.s32.totalorder %s1150_s22, 0 }
  0x58   : > { %s622_s6 = smul.u32 96, %s1046_s8  ;;  %s225_s9 = scalar_lea.sflag [#allocation6], %s1046_s8 }
  0x5a   : > { %s1050_s4 = scalar_lea.vmem [#allocation5], %s622_s6 }
  0x5b   : > { %825 = dma.done.wait (%p1159_p8), %s225_s9, 1536  }
  0x5c   : > { %827 = vsyncadd (%p1159_p8), %s225_s9, 4294965760  ;;  %v863_v0 = vmov 0.0   ;;  %vm864_vm0 = vmmov 0   ;;  %v272_v1 = vld [vmem:[%s1050_s4 + $0x20] sm:$0xff]  ;;  %v273_v8 = vld [vmem:[%s1050_s4 + $0x28] sm:$0xff]  ;;  %p258_p9 = scmp.lt.s32.totalorder %s846_s15, 1 }
  0x5d   : > { %601 = vmatprep.subr.bf16.mxu1 %v863_v0  ;;  %617 = vmatprep.mubr.msk.bf16.mxu1 %vm864_vm0, %v863_v0  ;;  %v268_v2 = vld [vmem:[%s1050_s4] sm:$0xff]  ;;  %v288_v4 = vunpack.c.l.s8.bf16 %v272_v1  ;;  %v289_v5 = vunpack.c.h.s8.bf16 %v272_v1  ;;  %v269_v9 = vld [vmem:[%s1050_s4 + $0x8] sm:$0xff]  ;;  %v290_v13 = vunpack.c.l.s8.bf16 %v273_v8  ;;  %v291_v17 = vunpack.c.h.s8.bf16 %v273_v8  ;;  %v274_v18 = vld [vmem:[%s1050_s4 + $0x30] sm:$0xff]  ;;  %s559_s25 = sshll.u32 %s1046_s8, 4  ;;  %s567_s10 = sshll.u32 %s846_s15, 7 }
  0x5e   : > { %v276_v3 = vld [vmem:[%s1050_s4 + $0x40] sm:$0xff]  ;;  %v280_v6 = vunpack.c.l.s8.bf16 %v268_v2  ;;  %v281_v10 = vunpack.c.h.s8.bf16 %v268_v2  ;;  %v277_v12 = vld [vmem:[%s1050_s4 + $0x48] sm:$0xff]  ;;  %v282_v15 = vunpack.c.l.s8.bf16 %v269_v9  ;;  %v283_v19 = vunpack.c.h.s8.bf16 %v269_v9  ;;  %v270_v22 = vld [vmem:[%s1050_s4 + $0x10] sm:$0xff]  ;;  %s259_s20 = scalar_select %p258_p9, %s846_s15, 1 }
  0x5f   : > { %v296_v7 = vunpack.c.l.s8.bf16 %v276_v3  ;;  %570 = vmatprep.subr.bf16.mxu0 %v288_v4  ;;  %v297_v11 = vunpack.c.h.s8.bf16 %v276_v3  ;;  %v708_v14 = vld [vmem:[#allocation2 + $0x4] ss:$12 sps:$4 sm:$0xff]   ;;  %v298_v16 = vunpack.c.l.s8.bf16 %v277_v12  ;;  %v299_v20 = vunpack.c.h.s8.bf16 %v277_v12  ;;  %v278_v23 = vld [vmem:[%s1050_s4 + $0x50] sm:$0xff]  ;;  %s254_s19 = scalar_lea.vmem [#allocation7], %s559_s25  ;;  %s1089_s26 = scalar_lea.hbm %s1141_s3, %s567_s10 }
  0x60   : > { %571 = vmatpush3.bf16.msra.mxu0 %v280_v6  ;;  %352 = vmatprep.mubr.bf16.mxu0 %v708_v14  ;;  %v292_v21 = vunpack.c.l.s8.bf16 %v274_v18  ;;  %v284_v24 = vunpack.c.l.s8.bf16 %v270_v22  ;;  %v300_v25 = vunpack.c.l.s8.bf16 %v278_v23  ;;  %v293_v26 = vunpack.c.h.s8.bf16 %v274_v18  ;;  %v275_v27 = vld [vmem:[%s1050_s4 + $0x38] sm:$0xff]  ;;  %v706_v38 = vld [vmem:[#allocation2] ss:$12 sps:$4 sm:$0xff]   ;;  %s560_s22 = sshll.u32 %s259_s20, 1  ;;  %s434_s5 = sshll.u32 %s254_s19, 4  ;;  %s1084_s5 = int_to_ptr.vmem [resolvable:$true] %s434_s5 }
  0x61   : > { %602 = vmatpush3.bf16.msra.mxu1 %v296_v7  ;;  %572 = vmatprep.subr.bf16.mxu0 %v289_v5  ;;  %v285_v28 = vunpack.c.h.s8.bf16 %v270_v22  ;;  %v301_v29 = vunpack.c.h.s8.bf16 %v278_v23  ;;  %v294_v30 = vunpack.c.l.s8.bf16 %v275_v27  ;;  %v271_v31 = vld [vmem:[%s1050_s4 + $0x18] sm:$0xff]  ;;  %v295_v35 = vunpack.c.h.s8.bf16 %v275_v27  ;;  %s261_s11 = scalar_lea.vmem %s1140_s2, %s560_s22  ;;  %s419_s7 = scalar_lea.sflag [#allocation4], %s1046_s8 }
  0x62   : > { %603 = vmatprep.subr.bf16.mxu1 %v863_v0  ;;  %v279_v32 = vld [vmem:[%s1050_s4 + $0x58] sm:$0xff]  ;;  %v286_v33 = vunpack.c.l.s8.bf16 %v271_v31  ;;  %v287_v36 = vunpack.c.h.s8.bf16 %v271_v31  ;;  %v564_v47 = vld [vmem:[%s261_s11] ss:$0 sm:$0xff]  ;;  %v565_v52 = vld [vmem:[%s261_s11 + $0x1] ss:$0 sm:$0xff]  ;;  %s768_s6 = scalar_lea.vmem %s1084_s5, 256 }
  0x63   : > { %v302_v34 = vunpack.c.l.s8.bf16 %v279_v32  ;;  %v303_v37 = vunpack.c.h.s8.bf16 %v279_v32  ;;  %v709_v39 = vld [vmem:[#allocation2 + $0x8] ss:$12 sps:$4 sm:$0xff]   ;;  %p769_p11 = scmp.ne.s32.totalorder %s1084_s5, %s768_s6  ;;  %p1160_p13 = scmp.ne.s32.totalorder %s1151_s23, 0 }
  0x64   : > { %573 = vmatpush3.bf16.msra.mxu0 %v281_v10  ;;  %s865_s15 = smov [#allocation7]  }
  0x65   : > { %604 = vmatpush3.bf16.msra.mxu1 %v297_v11  ;;  %574 = vmatprep.subr.bf16.mxu0 %v290_v13  ;;  %p770_p4 = pnand %p769_p11, %p1160_p13  ;;  %s772_s9 = sshll.u32 %s865_s15, 4  ;;  %s773_s9 = int_to_ptr.vmem [resolvable:$false] %s772_s9 }
  0x66   : > { %605 = vmatprep.subr.bf16.mxu1 %v863_v0  ;;  %s774_s4 = scalar_lea.vmem %s773_s9, 512  ;;  %p775_p10 = scmp.lt.s32.totalorder %s1084_s5, %s773_s9 }
  0x67   : > { %p771_p1 = pneg %p770_p4  ;;  %p776_p3 = scmp.lt.s32.totalorder %s774_s4, %s768_s6 }
  0x68   : > { %575 = vmatpush3.bf16.msra.mxu0 %v282_v15 }
  0x69   : > { %606 = vmatpush3.bf16.msra.mxu1 %v298_v16  ;;  %576 = vmatprep.subr.bf16.mxu0 %v291_v17  ;;  %p777_p6 = por %p776_p3, %p775_p10 }
  0x6a   : > { %607 = vmatprep.subr.bf16.mxu1 %v863_v0 }
  0x6b   : > { %p778_p0 = pnand %p777_p6, %p771_p1 }
  0x6c   : > { %577 = vmatpush3.bf16.msra.mxu0 %v283_v19 }
  0x6d   : > { %608 = vmatpush3.bf16.msra.mxu1 %v299_v20  ;;  %578 = vmatprep.subr.bf16.mxu0 %v292_v21 }
  0x6e   : > { %609 = vmatprep.subr.bf16.mxu1 %v863_v0 }
  0x70   : > { %579 = vmatpush3.bf16.msra.mxu0 %v284_v24 }
  0x71   : > { %610 = vmatpush3.bf16.msra.mxu1 %v300_v25  ;;  %580 = vmatprep.subr.bf16.mxu0 %v293_v26 }
  0x72   : > { %611 = vmatprep.subr.bf16.mxu1 %v863_v0 }
  0x74   : > { %581 = vmatpush3.bf16.msra.mxu0 %v285_v28 }
  0x75   : > { %612 = vmatpush3.bf16.msra.mxu1 %v301_v29  ;;  %582 = vmatprep.subr.bf16.mxu0 %v294_v30 }
  0x76   : > { %613 = vmatprep.subr.bf16.mxu1 %v863_v0 }
  0x78   : > { %583 = vmatpush3.bf16.msra.mxu0 %v286_v33 }
  0x79   : > { %614 = vmatpush3.bf16.msra.mxu1 %v302_v34  ;;  %584 = vmatprep.subr.bf16.mxu0 %v295_v35 }
  0x7a   : > { %615 = vmatprep.subr.bf16.mxu1 %v863_v0 }
  0x7c   : > { %585 = vmatpush3.bf16.msra.mxu0 %v287_v36 }
  0x7d   : > { %616 = vmatpush3.bf16.msra.mxu1 %v303_v37 }
  0x7f   : > { %353 = vmatmul.mubr.bf16.vlgmr.msra.gmra.mrb[0].mxu0 %v706_v38 }
  0x80   : > { %618 = vmatmul.mubr.bf16.vlgmr.msra.gmra.mrb[0].mxu1 %v709_v39 }
 0x152   : > { %v586_v40 = vpop.f32.mrb[0].mxu0 }
 0x153   : > { %v395_v41 = vpop.f32.mrb[0].mxu1  ;;  %v587_v42 = vpop.f32.mrb[1].mxu0 }
 0x154   : > { %v619_v43 = vpop.f32.mrb[1].mxu1  ;;  %v588_v44 = vadd.f32 %v587_v42, %v586_v40  ;;  %v589_v45 = vpop.f32.mrb[2].mxu0 }
 0x155   : > { %v398_v46 = vpop.f32.mrb[2].mxu1  ;;  %v590_v48 = vpop.f32.mrb[3].mxu0 }
 0x156   : > { %v620_v49 = vpop.f32.mrb[3].mxu1  ;;  %v396_v50 = vadd.f32 %v588_v44, %v395_v41  ;;  %v591_v51 = vadd.f32 %v590_v48, %v589_v45 }
 0x158   : > { %v407_v53 = vmul.f32 %v564_v47, %v396_v50  ;;  %v399_v54 = vadd.f32 %v591_v51, %v398_v46 }
 0x15a   : > { %v414_v55 = vadd.f32 %v565_v52, %v407_v53  ;;  %v408_v56 = vmul.f32 %v564_v47, %v399_v54 }
 0x15c   : > { %416 = vst [vmem:[%s254_s19] sm:$0xff] %v414_v55  ;;  %v415_v57 = vadd.f32 %v565_v52, %v408_v56 }
 0x15e   : > { %417 = vst [vmem:[%s254_s19 + $0x8] sm:$0xff] %v415_v57 }
 0x15f   : > { %781 = shalt.err (!%p778_p0)
}
 0x160   : > { %s782_s20 = scalar_lea.hbm %s1089_s26, 256  ;;  %s786_s29 = scalar_lea.hbm %s1141_s3, 512 }
 0x161   : > { %p783_p2 = scmp.ne.s32.totalorder %s1089_s26, %s782_s20  ;;  %p787_p5 = scmp.lt.u32.totalorder %s1089_s26, %s1141_s3 }
 0x162   : > { %p788_p8 = scmp.lt.u32.totalorder %s786_s29, %s782_s20  ;;  %p790_p11 = scmp.lt.u32.totalorder %s782_s20, %s1089_s26 }
 0x163   : > { %p784_p7 = pnand %p783_p2, %p1160_p13 }
 0x164   : > { %p789_p9 = por %p788_p8, %p787_p5 }
 0x165   : > { %p785_p12 = pneg %p784_p7 }
 0x166   : > { %p791_p4 = por %p790_p11, %p789_p9 }
 0x168   : > { %p792_p1 = pnand %p791_p4, %p785_p12 }
 0x16a   : > { %795 = shalt.err (!%p792_p1)
}
 0x16b   : > { %s866_s19 = smov 128   ;;  %s867_s10 = smov 256  }
 0x16c   : > { %s868_s27 = smov 8  }
 0x16d   : > { %629 = dma.vmem_to_hbm [thread:$0]  (%p1160_p13), %s1084_s5, 256, %s1089_s26, %s419_s7, %s866_s19, %s867_s10, %s868_s27  }
 0x16e PF: > { %s449_s21 = sand.u32 1, %s834_s12   ;;  %p1161_p10 = scmp.ne.s32.totalorder %s1152_s24, 0 }
 0x16f   : > { %p1162_p3 = scmp.ge.s32.totalorder %s854_s17, 2  ;;  %s450_s6 = scalar_lea.sflag [#allocation4], %s449_s21 }
 0x171   : > { %p640_p6 = pnand %p1162_p3, %p1161_p10 }
 0x173   : > { %829 = dma.done.wait (!%p640_p6), %s450_s6, 256  }
 0x174   : > { %831 = vsyncadd (!%p640_p6), %s450_s6, 4294967040  ;;  %s20_s17 = sadd.s32 1, %s854_s17   ;;  %s1163_s12 = smov %s838_s13 }
 0x175   : > { %p17_p0 = scmp.ge.s32.totalorder %s20_s17, 4   ;;  %s1164_s13 = smov %s842_s14 }
 0x176   : > { %s1165_s14 = smov %s1007_s18  ;;  %s1166_s15 = smov %s850_s16 }
 0x177   : > { %s1167_s16 = smov %s1169_s30  ;;  %19 = sbr.rel (!%p17_p0) target bundleno = 7 (0x7), region = 86 }
 0x17e   :  { %455 = vsyncpa [#allocation3], 1 }
 0x17f   :  { %457 = vsyncpa [#allocation3 + $0x1], 1 }
 0x180   :  { %458 = vsyncpa [#allocation6], 1 }
 0x181   :  { %460 = vsyncpa [#allocation6 + $0x1], 1 }
 0x182   :  { %461 = vsyncpa [#allocation4], 1 }
 0x183   :  { %463 = vsyncpa [#allocation4 + $0x1], 1 }

</bundles_post_ra>
